<compile_context>
chip_gen: v6e
topology: v6e:2x2x1
jax: 0.10.0
libtpu: 0.0.40
codegen_flags: <defaults>
</compile_context>

<pallas_src>
import jax
import jax.numpy as jnp
from jax import lax
from jax.experimental import pallas as pl
from jax.experimental.pallas import tpu as pltpu


def _t5wiki_head_kernel(h_ref, m_ref, w_ref, b_ref, o_ref, acc_sum, acc_cnt):
    """One (batch_tile, seq_tile) grid step.

    h_ref : (bt, st, D)  encoder last_hidden_state tile (input dtype, e.g. bf16)
    m_ref : (bt, 1, st)  attention-mask tile (same dtype, 0/1) — lane-dense in seq
    w_ref : (D, O)       out_mlp weight (transposed), VMEM-resident
    b_ref : (1, O)       out_mlp bias, VMEM-resident
    o_ref : (bt, O)      output tile — written ONLY on the last seq step
    acc_sum : (bt, D) f32 VMEM scratch  — masked-sum accumulator
    acc_cnt : (bt, 1) f32 VMEM scratch  — token-count accumulator
    """
    s_idx = pl.program_id(1)

    @pl.when(s_idx == 0)
    def _init():
        acc_sum[...] = jnp.zeros_like(acc_sum)
        acc_cnt[...] = jnp.zeros_like(acc_cnt)

    # STPoolingAdapter (mean): masked sum over this seq tile, done on the MXU
    # as a batched (1, st) @ (st, D) contraction with f32 accumulation.  No
    # f32 (bt, st, D) intermediate, no VPU mask-multiply.
    h = h_ref[...]                                           # (bt, st, D)
    m = m_ref[...]                                           # (bt, 1, st)
    contrib = lax.dot_general(
        m, h,
        dimension_numbers=(((2,), (1,)), ((0,), (0,))),      # contract seq, batch bt
        preferred_element_type=jnp.float32)                  # (bt, 1, D)
    acc_sum[...] += contrib[:, 0, :]                         # (bt, D)
    acc_cnt[...] += jnp.sum(m.astype(jnp.float32), axis=2)   # (bt, 1)

    @pl.when(s_idx == pl.num_programs(1) - 1)
    def _finalize():
        # mean = sum / clamp(count, min=1e-9).  NOTE: the approximate (EUP)
        # reciprocal's per-row uniform scale error cancels exactly in the L2
        # normalization below — only valid because normalize follows.
        counts = jnp.maximum(acc_cnt[...], 1e-9)
        mean = acc_sum[...] * pl.reciprocal(counts, approx=True)      # (bt, D)

        # F.normalize(p=2, dim=1): x / max(||x||_2, 1e-12)
        sq = jnp.sum(mean * mean, axis=1, keepdims=True)              # (bt, 1)
        normed = mean * lax.rsqrt(jnp.maximum(sq, 1e-24))             # (bt, D)

        # out_mlp (Linear) + out_tanh; out_dropout is identity at inference.
        out = jnp.dot(normed, w_ref[...], preferred_element_type=jnp.float32)
        out = out + b_ref[...]
        o_ref[...] = jnp.tanh(out).astype(o_ref.dtype)


def _pick_tile(n, pref, align):
    """Largest tile <= pref that is a multiple of `align` and divides n; else n."""
    if n <= pref:
        return n
    t = (pref // align) * align
    while t >= align:
        if n % t == 0:
            return t
        t -= align
    return n


def _vmem_capacity_bytes():
    """Per-core VMEM capacity; defensive fallbacks if the query fails."""
    try:
        cap = getattr(pltpu.get_tpu_info(), "vmem_capacity_bytes", None)
        if cap:
            return int(cap)
    except Exception:
        pass
    try:
        kind = jax.devices()[0].device_kind.lower()
        if "7" in kind:                      # v7x: 64 MiB per TensorCore
            return 64 * 1024 * 1024
        return 128 * 1024 * 1024             # v4/v5e/v6e: 128 MiB
    except Exception:
        pass
    return 64 * 1024 * 1024                  # conservative last resort


def _pick_batch_tile(B):
    """Batch tile for the output block (second-to-last dim: multiple of 8 or full B).

    Prefer 8 so the batch grid axis (the only 'parallel' axis, sharded across
    v7x's two TensorCores) has >= 2 steps; B % 16 == 0 gives an even split.
    """
    if B % 8 == 0 and B > 8:
        return 8
    return B


def _pick_seq_tile(S, D, O, batch_tile, itemsize, vmem_limit_bytes):
    """Seq tile from a byte budget (NOT a per-generation guess).

    The kernel is pure HBM streaming with ~0.35 us fixed overhead per grid
    step, so larger tiles matter most on fast-HBM parts (v7x).  Target an
    8-16 MiB h tile, double-buffered, after reserving the (double-buffered)
    resident weight/bias blocks, all within the scoped VMEM window.
    """
    resident = 2 * (D * O * 4 + O * 4)           # w + b, double-buffered, f32
    resident += batch_tile * (D + 1) * 4         # f32 accumulators
    resident += 2 * batch_tile * O * 4           # output block, double-buffered
    avail = max(vmem_limit_bytes - resident, vmem_limit_bytes // 4)
    per_buffer = int(avail * 0.55) // 2          # h (+mask) are double-buffered
    cap = min(per_buffer, 16 * 1024 * 1024) // max(batch_tile * D * itemsize, 1)
    cap = max((cap // 128) * 128, 128)
    return _pick_tile(S, cap, 128)


def t5wiki_head(last_hidden_state, attention_mask, w, b, *,
                batch_tile=None, seq_tile=None):
    """T5WikiLayer head.

    last_hidden_state : [B, S, D] encoder output (f32 or bf16; bf16 preferred
                        to halve HBM traffic — accumulation is f32 on the MXU)
    attention_mask    : [B, S]    0/1 mask
    w                 : [O, D]    out_mlp weight (PyTorch Linear layout)
    b                 : [O]       out_mlp bias
    returns           : [B, O]    f32 embeddings (pool -> normalize -> linear -> tanh)
    """
    B, S, D = last_hidden_state.shape
    O = w.shape[0]
    dt = last_hidden_state.dtype
    itemsize = jnp.dtype(dt).itemsize

    vmem_cap = _vmem_capacity_bytes()
    vmem_limit = min(vmem_cap * 3 // 4, 96 * 1024 * 1024)   # 96 MiB on 128-MiB parts, 48 MiB on v7x

    if batch_tile is None:
        batch_tile = _pick_batch_tile(B)
    if seq_tile is None:
        seq_tile = _pick_seq_tile(S, D, O, batch_tile, itemsize, vmem_limit)
    assert B % batch_tile == 0 and S % seq_tile == 0, \
        "batch/seq tiles must divide B/S (pad outside the kernel for ragged shapes)"

    # Mask as [B, 1, S] in the hidden-state dtype: lane-dense along seq (no
    # 128x lane padding, contiguous DMA rows), ready for the MXU contraction.
    mask3 = attention_mask.astype(dt).reshape(B, 1, S)
    w_t = jnp.asarray(w, jnp.float32).T              # (D, O), VMEM-resident
    b2 = jnp.asarray(b, jnp.float32).reshape(1, O)

    grid = (B // batch_tile, S // seq_tile)

    cost = pl.CostEstimate(
        flops=int(2 * B * S * D + 2 * B * D * O),
        transcendentals=int(B * (O + 2)),
        bytes_accessed=int(B * S * D * itemsize + B * S * itemsize
                           + D * O * 4 + O * 4 + B * O * 4),
    )

    return pl.pallas_call(
        _t5wiki_head_kernel,
        out_shape=jax.ShapeDtypeStruct((B, O), jnp.float32),
        grid_spec=pltpu.PrefetchScalarGridSpec(
            num_scalar_prefetch=0,
            grid=grid,
            in_specs=[
                pl.BlockSpec((batch_tile, seq_tile, D), lambda bi, si: (bi, si, 0)),
                pl.BlockSpec((batch_tile, 1, seq_tile), lambda bi, si: (bi, 0, si)),
                pl.BlockSpec((D, O), lambda bi, si: (0, 0)),   # DMA'd once, resident
                pl.BlockSpec((1, O), lambda bi, si: (0, 0)),   # DMA'd once, resident
            ],
            # Resident-accumulator output: index_map ignores the seq axis and
            # the block is written only on the last seq step.
            out_specs=pl.BlockSpec((batch_tile, O), lambda bi, si: (bi, 0)),
            scratch_shapes=[
                pltpu.VMEM((batch_tile, D), jnp.float32),   # masked-sum accumulator
                pltpu.VMEM((batch_tile, 1), jnp.float32),   # token-count accumulator
            ],
        ),
        compiler_params=pltpu.CompilerParams(
            # batch tiles shard across v7x's 2 TensorCores; seq is a reduction.
            dimension_semantics=("parallel", "arbitrary"),
            vmem_limit_bytes=int(vmem_limit),
        ),
        cost_estimate=cost,
    )(last_hidden_state, mask3, w_t, b2)


def _reference(last_hidden_state, attention_mask, w, b):
    """Pure-JAX reference of the same math for a correctness check."""
    h = last_hidden_state.astype(jnp.float32)
    m = attention_mask.astype(jnp.float32)[..., None]
    summed = jnp.sum(h * m, axis=1)
    counts = jnp.maximum(jnp.sum(m, axis=1), 1e-9)
    mean = summed / counts
    norm = jnp.linalg.norm(mean, axis=1, keepdims=True)
    normed = mean / jnp.maximum(norm, 1e-12)
    return jnp.tanh(normed @ w.T + b)


if __name__ == "__main__":
    key = jax.random.PRNGKey(0)

    # --- Test 1: module-sized toy shapes (single grid step) ------------------
    # narr_args (synthetic): size=32, out_mlp=16 (!= size -> use_out_mlp),
    # out_tanh=True, dropouts -> identity at inference.
    B, S, D, O = 2, 8, 32, 16
    k_h, k_w, k_b, k_h2, k_m2 = jax.random.split(key, 5)

    # Stand-in for the T5 encoder output (bf16, as a real encoder would emit).
    last_hidden_state = jax.random.normal(k_h, (B, S, D), jnp.float32).astype(jnp.bfloat16)
    lengths = jnp.array([8, 5], dtype=jnp.int32)
    attention_mask = (jnp.arange(S)[None, :] < lengths[:, None]).astype(jnp.float32)

    bound = 1.0 / (D ** 0.5)
    w = jax.random.uniform(k_w, (O, D), jnp.float32, -bound, bound)
    b = jax.random.uniform(k_b, (O,), jnp.float32, -bound, bound)

    out = jax.block_until_ready(t5wiki_head(last_hidden_state, attention_mask, w, b))
    ref = _reference(last_hidden_state, attention_mask, w, b)
    assert out.shape == (B, O)
    assert jnp.allclose(out, ref, atol=5e-4, rtol=5e-4), "mismatch vs reference (test 1)"

    # --- Test 2: multi-tile grid (exercises batch x seq accumulation) --------
    B2, S2, D2, O2 = 16, 256, 128, 64
    h2 = jax.random.normal(k_h2, (B2, S2, D2), jnp.float32).astype(jnp.bfloat16)
    len2 = jax.random.randint(k_m2, (B2,), 1, S2 + 1)
    mask2 = (jnp.arange(S2)[None, :] < len2[:, None]).astype(jnp.float32)
    bound2 = 1.0 / (D2 ** 0.5)
    w2 = jax.random.uniform(k_w, (O2, D2), jnp.float32, -bound2, bound2)
    b2 = jax.random.uniform(k_b, (O2,), jnp.float32, -bound2, bound2)

    ref2 = _reference(h2, mask2, w2, b2)

    # explicit tiles -> grid (2, 2): multi-step seq accumulation
    out2 = jax.block_until_ready(
        t5wiki_head(h2, mask2, w2, b2, batch_tile=8, seq_tile=128))
    assert out2.shape == (B2, O2)
    assert jnp.allclose(out2, ref2, atol=5e-4, rtol=5e-4), "mismatch vs reference (test 2)"

    # default tiles -> exercises the byte-budget tiling + megacore guard
    out2b = jax.block_until_ready(t5wiki_head(h2, mask2, w2, b2))
    assert jnp.allclose(out2b, ref2, atol=5e-4, rtol=5e-4), "mismatch vs reference (test 2b)"

    print("KERNEL_OK")
</pallas_src>

<mosaic_0001>
module attributes {stable_mosaic.version = 11 : i64} {
  func.func @_t5wiki_head_kernel(%arg0: i32, %arg1: i32, %arg2: memref<2x8x32xbf16, #tpu.memory_space<vmem>>, %arg3: memref<2x1x8xbf16, #tpu.memory_space<vmem>>, %arg4: memref<32x16xf32, #tpu.memory_space<vmem>>, %arg5: memref<1x16xf32, #tpu.memory_space<vmem>>, %arg6: memref<2x16xf32, #tpu.memory_space<vmem>>, %arg7: memref<2x32xf32, #tpu.memory_space<vmem>>, %arg8: memref<2x1xf32, #tpu.memory_space<vmem>>) attributes {dimension_semantics = [#tpu.dimension_semantics<parallel>, #tpu.dimension_semantics<arbitrary>], iteration_bounds = array<i64: 1, 1>, scalar_prefetch = 0 : i64, scratch_operands = 2 : i64, tpu.core_type = #tpu.core_type<tc>, window_params = [{transform_indices = @transform_0, window_bounds = array<i64: 2, 8, 32>}, {transform_indices = @transform_1, window_bounds = array<i64: 2, 1, 8>}, {pipeline_mode = #tpu.pipeline_mode<synchronous>, transform_indices = @transform_2, window_bounds = array<i64: 32, 16>}, {pipeline_mode = #tpu.pipeline_mode<synchronous>, transform_indices = @transform_3, window_bounds = array<i64: 1, 16>}, {transform_indices = @transform_4, window_bounds = array<i64: 2, 16>}]} {
    %c0_i32 = arith.constant 0 : i32
    %0 = arith.cmpi eq, %arg1, %c0_i32 : i32
    %1 = arith.extui %0 : i1 to i32
    %c0_i32_0 = arith.constant 0 : i32
    %2 = arith.cmpi ne, %1, %c0_i32_0 : i32
    scf.if %2 {
      %cst_17 = arith.constant 0.000000e+00 : f32
      %18 = vector.broadcast %cst_17 : f32 to vector<2x32xf32>
      %c0_18 = arith.constant 0 : index
      %c0_19 = arith.constant 0 : index
      %19 = vector.load %arg7[%c0_18, %c0_19] : memref<2x32xf32, #tpu.memory_space<vmem>>, vector<2x32xf32>
      tpu.vector_store %arg7[%c0_18, %c0_19], %18 {strides = array<i32>} : memref<2x32xf32, #tpu.memory_space<vmem>>, vector<2x32xf32>,
      %cst_20 = arith.constant 0.000000e+00 : f32
      %20 = vector.broadcast %cst_20 : f32 to vector<2x1xf32>
      %c0_21 = arith.constant 0 : index
      %c0_22 = arith.constant 0 : index
      %21 = vector.load %arg8[%c0_21, %c0_22] : memref<2x1xf32, #tpu.memory_space<vmem>>, vector<2x1xf32>
      tpu.vector_store %arg8[%c0_21, %c0_22], %20 {strides = array<i32>} : memref<2x1xf32, #tpu.memory_space<vmem>>, vector<2x1xf32>,
    } else {
    }
    %c0 = arith.constant 0 : index
    %c0_1 = arith.constant 0 : index
    %c0_2 = arith.constant 0 : index
    %3 = vector.load %arg2[%c0, %c0_1, %c0_2] : memref<2x8x32xbf16, #tpu.memory_space<vmem>>, vector<2x8x32xbf16>
    %c0_3 = arith.constant 0 : index
    %c0_4 = arith.constant 0 : index
    %c0_5 = arith.constant 0 : index
    %4 = vector.load %arg3[%c0_3, %c0_4, %c0_5] : memref<2x1x8xbf16, #tpu.memory_space<vmem>>, vector<2x1x8xbf16>
    %cst = arith.constant dense<0.000000e+00> : vector<2x1x32xf32>
    %5 = tpu.matmul %4, %3, %cst {dimension_numbers = #tpu.dot_dimension_numbers<[2], [1], [1], [2], [0, 0, 0, 1, 1, 2], [0], [0]>} : vector<2x1x8xbf16>, vector<2x8x32xbf16>, vector<2x1x32xf32> -> vector<2x1x32xf32>
    %c0_6 = arith.constant 0 : index
    %c0_7 = arith.constant 0 : index
    %6 = vector.load %arg7[%c0_6, %c0_7] : memref<2x32xf32, #tpu.memory_space<vmem>>, vector<2x32xf32>
    %7 = vector.shape_cast %5 : vector<2x1x32xf32> to vector<2x32xf32>
    %8 = arith.addf %6, %7 : vector<2x32xf32>
    %c0_8 = arith.constant 0 : index
    %c0_9 = arith.constant 0 : index
    %9 = vector.load %arg7[%c0_8, %c0_9] : memref<2x32xf32, #tpu.memory_space<vmem>>, vector<2x32xf32>
    tpu.vector_store %arg7[%c0_8, %c0_9], %8 {strides = array<i32>} : memref<2x32xf32, #tpu.memory_space<vmem>>, vector<2x32xf32>,
    %c0_10 = arith.constant 0 : index
    %c0_11 = arith.constant 0 : index
    %10 = vector.load %arg8[%c0_10, %c0_11] : memref<2x1xf32, #tpu.memory_space<vmem>>, vector<2x1xf32>
    %11 = arith.extf %4 : vector<2x1x8xbf16> to vector<2x1x8xf32>
    %cst_12 = arith.constant dense<0.000000e+00> : vector<2x1xf32>
    %12 = vector.multi_reduction <add>, %11, %cst_12 [2] : vector<2x1x8xf32> to vector<2x1xf32>
    %13 = arith.addf %10, %12 : vector<2x1xf32>
    %c0_13 = arith.constant 0 : index
    %c0_14 = arith.constant 0 : index
    %14 = vector.load %arg8[%c0_13, %c0_14] : memref<2x1xf32, #tpu.memory_space<vmem>>, vector<2x1xf32>
    tpu.vector_store %arg8[%c0_13, %c0_14], %13 {strides = array<i32>} : memref<2x1xf32, #tpu.memory_space<vmem>>, vector<2x1xf32>,
    %c0_i32_15 = arith.constant 0 : i32
    %15 = arith.cmpi eq, %arg1, %c0_i32_15 : i32
    %16 = arith.extui %15 : i1 to i32
    %c0_i32_16 = arith.constant 0 : i32
    %17 = arith.cmpi ne, %16, %c0_i32_16 : i32
    scf.if %17 {
      %c0_17 = arith.constant 0 : index
      %c0_18 = arith.constant 0 : index
      %18 = vector.load %arg8[%c0_17, %c0_18] : memref<2x1xf32, #tpu.memory_space<vmem>>, vector<2x1xf32>
      %cst_19 = arith.constant 9.99999971E-10 : f32
      %19 = vector.broadcast %cst_19 : f32 to vector<2x1xf32>
      %20 = arith.maximumf %18, %19 : vector<2x1xf32>
      %c0_20 = arith.constant 0 : index
      %c0_21 = arith.constant 0 : index
      %21 = vector.load %arg7[%c0_20, %c0_21] : memref<2x32xf32, #tpu.memory_space<vmem>>, vector<2x32xf32>
      %22 = tpu.reciprocal %20 {approx = true} : vector<2x1xf32> -> vector<2x1xf32>
      %23 = vector.broadcast %22 : vector<2x1xf32> to vector<2x32xf32>
      %24 = arith.mulf %21, %23 : vector<2x32xf32>
      %25 = arith.mulf %24, %24 : vector<2x32xf32>
      %cst_22 = arith.constant dense<0.000000e+00> : vector<2xf32>
      %26 = vector.multi_reduction <add>, %25, %cst_22 [1] : vector<2x32xf32> to vector<2xf32>
      %27 = vector.shape_cast %26 : vector<2xf32> to vector<2x1xf32>
      %cst_23 = arith.constant 1.000000e-24 : f32
      %28 = vector.broadcast %cst_23 : f32 to vector<2x1xf32>
      %29 = arith.maximumf %27, %28 : vector<2x1xf32>
      %30 = math.rsqrt %29 : vector<2x1xf32>
      %31 = vector.broadcast %30 : vector<2x1xf32> to vector<2x32xf32>
      %32 = arith.mulf %24, %31 : vector<2x32xf32>
      %c0_24 = arith.constant 0 : index
      %c0_25 = arith.constant 0 : index
      %33 = vector.load %arg4[%c0_24, %c0_25] : memref<32x16xf32, #tpu.memory_space<vmem>>, vector<32x16xf32>
      %cst_26 = arith.constant dense<0.000000e+00> : vector<2x16xf32>
      %34 = tpu.matmul %32, %33, %cst_26 {dimension_numbers = #tpu.dot_dimension_numbers<[1], [0], [0], [1], [0, 0, 1, 1], [], []>} : vector<2x32xf32>, vector<32x16xf32>, vector<2x16xf32> -> vector<2x16xf32>
      %c0_27 = arith.constant 0 : index
      %c0_28 = arith.constant 0 : index
      %35 = vector.load %arg5[%c0_27, %c0_28] : memref<1x16xf32, #tpu.memory_space<vmem>>, vector<1x16xf32>
      %36 = vector.broadcast %35 : vector<1x16xf32> to vector<2x16xf32>
      %37 = arith.addf %34, %36 : vector<2x16xf32>
      %38 = math.tanh %37 : vector<2x16xf32>
      %c0_29 = arith.constant 0 : index
      %c0_30 = arith.constant 0 : index
      %39 = vector.load %arg6[%c0_29, %c0_30] : memref<2x16xf32, #tpu.memory_space<vmem>>, vector<2x16xf32>
      tpu.vector_store %arg6[%c0_29, %c0_30], %38 {strides = array<i32>} : memref<2x16xf32, #tpu.memory_space<vmem>>, vector<2x16xf32>,
    } else {
    }
    return
  }
  func.func @transform_0(%arg0: i32, %arg1: i32) -> (i32, i32, i32) {
    %c0_i32 = arith.constant 0 : i32
    %c0_i32_0 = arith.constant 0 : i32
    return %arg0, %arg1, %c0_i32 : i32, i32, i32
  }
  func.func @transform_1(%arg0: i32, %arg1: i32) -> (i32, i32, i32) {
    %c0_i32 = arith.constant 0 : i32
    %c0_i32_0 = arith.constant 0 : i32
    return %arg0, %c0_i32, %arg1 : i32, i32, i32
  }
  func.func @transform_2(%arg0: i32, %arg1: i32) -> (i32, i32) {
    %c0_i32 = arith.constant 0 : i32
    %c0_i32_0 = arith.constant 0 : i32
    %c0_i32_1 = arith.constant 0 : i32
    return %c0_i32, %c0_i32_0 : i32, i32
  }
  func.func @transform_3(%arg0: i32, %arg1: i32) -> (i32, i32) {
    %c0_i32 = arith.constant 0 : i32
    %c0_i32_0 = arith.constant 0 : i32
    %c0_i32_1 = arith.constant 0 : i32
    return %c0_i32, %c0_i32_0 : i32, i32
  }
  func.func @transform_4(%arg0: i32, %arg1: i32) -> (i32, i32) {
    %c0_i32 = arith.constant 0 : i32
    %c0_i32_0 = arith.constant 0 : i32
    return %arg0, %c0_i32 : i32, i32
  }
}

</mosaic_0001>

<bundles_post_ra>
// kernel: tpu_custom_call.1
= control target key start
LH: loop header
LB: loop body
LE: loop exit
PB: predicated region body
PF: predicated region fallthrough
CT: control target
= control target key end

     0   :  { %vm138_vm0 = vcmask 57344   ;;  %v345_v4 = vmov 0.0   ;;  %vm35_vm1 = vcmask 1043456   ;;  %vm346_vm2 = vmmov 0   ;;  %s422_s0 = inlined_call_operand.vmem [shape: bf16[2,8,32], index: 0, kind: input, shape index: {}]   ;;  %s423_s1 = inlined_call_operand.vmem [shape: bf16[2,1,8], index: 1, kind: input, shape index: {}]   ;;  %s424_s2 = inlined_call_operand.vmem [shape: f32[32,16], index: 2, kind: input, shape index: {}]   ;;  %s425_s3 = inlined_call_operand.vmem [shape: f32[1,16], index: 3, kind: input, shape index: {}]   ;;  %s426_s4 = inlined_call_operand.hbm [shape: f32[2,16], index: 4, kind: output, shape index: {}]  }
   0x1   :  { %v30_v0 = vld [vmem:[%s423_s1 + $0x1] sm:$0x1]  ;;  %v29_v1 = vld [vmem:[%s423_s1] sm:$0x1]  ;;  %294 = vmatprep.subr.bf16.mxu1 %v345_v4  ;;  %v28_v5 = vld [vmem:[%s422_s0 + $0x4] sm:$0xf]  ;;  %288 = vmatprep.subr.bf16.mxu0 %v345_v4 }
   0x2   :  { %v137_v2 = vunpack.c.l.bf16 %v30_v0  ;;  %v136_v3 = vunpack.c.l.bf16 %v29_v1  ;;  %v27_v6 = vld [vmem:[%s422_s0] sm:$0xf]  ;;  %v83_v7 = vsel %vm35_vm1, %v28_v5, 0  ;;  %296 = vmatprep.mubr.msk.bf16.mxu1 %vm346_vm2, %v345_v4  ;;  %290 = vmatprep.mubr.msk.bf16.mxu0 %vm346_vm2, %v345_v4 }
   0x3   :  { %v37_v8 = vsel %vm35_vm1, %v27_v6, 0 }
   0x4   :  { %9 = vsyncpa [#allocation5], 0  ;;  %v142_v9 = vsel %vm138_vm0, %v137_v2, 0.0  ;;  %295 = vmatpush3.bf16.msra.mxu1 %v83_v7  ;;  %289 = vmatpush3.bf16.msra.mxu0 %v37_v8  ;;  %vm31_vm3 = vcmask 64512   ;;  %v139_v10 = vsel %vm138_vm0, %v136_v3, 0.0  ;;  %vm25_vm4 = vcmask 1024  }
   0x5   :  { %143 = vadd.xlane.f32.xlu0 %v142_v9  ;;  %300 = vmatprep.subr.mxu0 %v345_v4  ;;  %26 = vst.msk [vmem:[#allocation3] sm:$0x3] %vm25_vm4, %v345_v4  ;;  %v347_v11 = vmov 0   ;;  %vm23_vm5 = vcmask 254976   ;;  %vm129_vm6 = vcmask 1041409   ;;  %v176_v38 = vld [vmem:[%s424_s2 + $0x18] sm:$0xff] }
   0x6   :  { %315 = vset.pattern.permute.xlu1 %v347_v11  ;;  %316 = vset.pattern.permute.xlu0 %v347_v11  ;;  %24 = vst.msk [vmem:[#allocation2] sm:$0x3] %vm23_vm5, %v345_v4  ;;  %v175_v39 = vld [vmem:[%s424_s2 + $0x10] sm:$0xff]  ;;  %v174_v40 = vld [vmem:[%s424_s2 + $0x8] sm:$0xff]  ;;  %v173_v41 = vld [vmem:[%s424_s2] sm:$0xff]  ;;  %vm184_vm7 = vcmask 261120  }
   0x7   :  { %297 = vmatmul.mubr.msk.bf16.vlgmr.msra.gmra.mxu1 %vm31_vm3, %v30_v0  ;;  %291 = vmatmul.mubr.msk.bf16.vlgmr.msra.gmra.mxu0 %vm31_vm3, %v29_v1  ;;  %v277_v46 = vld [vmem:[%s425_s3] ss:$0 sm:$0xff]  ;;  %s348_s2 = smov [#allocation4]   ;;  %vm259_vm8 = vcmask 123904  }
   0x8   :  { %308 = vmatprep.mubr.msk.f32.mxu0 %vm346_vm2, %v345_v4  ;;  %301 = vmatpush3.msra.mxu0 %v176_v38  ;;  %s267_s5 = sshll.u32 %s348_s2, 4  ;;  %s268_s5 = int_to_ptr.vmem [resolvable:$true] %s267_s5 }
   0x9   :  { %140 = vadd.xlane.f32.xlu0 %v139_v10  ;;  %302 = vmatprep.subr.mxu0 %v345_v4  ;;  %s323_s6 = scalar_lea.vmem %s268_s5, 32  ;;  %p328_p1 = scmp.lt.s32.totalorder %s268_s5, %s268_s5 }
   0xa   :  { %303 = vmatpush3.msra.mxu0 %v175_v39  ;;  %p324_p0 = scmp.ne.s32.totalorder %s268_s5, %s323_s6  ;;  %p329_p2 = scmp.lt.s32.totalorder %s323_s6, %s323_s6 }
   0xb   :  { %304 = vmatprep.subr.mxu0 %v345_v4 }
   0xc   :  { %v135_v14 = vld [vmem:[#allocation3] sm:$0x3]  ;;  %305 = vmatpush3.msra.mxu0 %v174_v40  ;;  %p330_p3 = por %p329_p2, %p328_p1 }
   0xd   :  { %v125_v24 = vld [vmem:[#allocation2] sm:$0x3]  ;;  %306 = vmatprep.subr.mxu0 %v345_v4 }
   0xe   :  { %307 = vmatpush3.msra.mxu0 %v173_v41  ;;  %p331_p4 = pnand %p330_p3, %p324_p0 }
  0x8e   :  { %v144_v12 = vpop.xlane.xlu0 %143 }
  0x8f   :  { %v147_v13 = vrot.slane %v144_v12, 7 }
  0x92   :  { %v141_v15 = vpop.xlane.xlu0 %140 }
  0x93   :  { %v148_v16 = vsel %vm129_vm6, %v147_v13, %v141_v15 }
  0x94   :  { %v150_v17 = vadd.f32 %v148_v16, %v135_v14 }
  0x96   :  { %152 = vst.msk [vmem:[#allocation3] sm:$0x3] %vm25_vm4, %v150_v17 }
  0x9d   :  { %v156_v18 = vld [vmem:[#allocation3] sm:$0x3] }
  0x9e   :  { %v157_v19 = vmax.f32 %v156_v18, 1e-09 }
  0xa0   :  { %317 = vrcp.f32 %v157_v19 }
  0xad   :  { %v318_v20 = vpop.eup %317 }
  0xae   :  { %162 = vperm.xlu1 %315, %v318_v20  }
  0xc7   :  { %v119_v21 = vpop.f32.mrf.mxu1  ;;  %v73_v22 = vpop.f32.mrf.mxu0 }
  0xc8   :  { %v128_v23 = vrot.slane %v119_v21, 7 }
  0xc9   :  { %v298_v25 = vpop.f32.mrf.mxu1  ;;  %v292_v26 = vpop.f32.mrf.mxu0 }
  0xca   :  { %v130_v27 = vsel %vm129_vm6, %v128_v23, %v73_v22 }
  0xcb   :  { %v132_v28 = vadd.f32 %v130_v27, %v125_v24  ;;  %v122_v29 = vpop.f32.mrf.mxu1  ;;  %v76_v30 = vpop.f32.mrf.mxu0 }
  0xcd   :  { %134 = vst.msk [vmem:[#allocation2] sm:$0x3] %vm23_vm5, %v132_v28  ;;  %v299_v31 = vpop.f32.mrf.mxu1  ;;  %v293_v32 = vpop.f32.mrf.mxu0 }
  0xd4   :  { %v158_v33 = vld [vmem:[#allocation2] sm:$0x3] }
 0x129   :  { %v163_v34 = vpop.permute.xlu1 %162 }
 0x12a   :  { %v165_v35 = vmul.f32 %v163_v34, %v158_v33 }
 0x12c   :  { %v166_v36 = vmul.f32 %v165_v35, %v165_v35 }
 0x12e   :  { %v167_v37 = vsel %vm23_vm5, %v166_v36, 0.0 }
 0x12f   :  { %168 = vadd.xlane.f32.xlu1 %v167_v37 }
 0x1b8   :  { %v169_v42 = vpop.xlane.xlu1 %168 }
 0x1b9   :  { %v170_v43 = vmax.f32 %v169_v42, 1e-24 }
 0x1bb   :  { %319 = vrsqrt.f32 %v170_v43 }
 0x1c8   :  { %v320_v44 = vpop.eup %319 }
 0x1c9   :  { %v172_v45 = vmul.f32 %v320_v44, %v165_v35 }
 0x1cb   :  { %309 = vmatmul.mubr.msk.f32.vlgmr.msra.gmra.mxu0 %vm184_vm7, %v172_v45 }
 0x28b   :  { %v254_v47 = vpop.f32.mrf.mxu0 }
 0x28c   :  { %v255_v48 = vadd.f32 %v277_v46, %v254_v47 }
 0x28d   :  { %v310_v49 = vpop.f32.mrf.mxu0 }
 0x28e   :  { %321 = vtanh.f32 %v255_v48 }
 0x29b   :  { %v322_v50 = vpop.eup %321 }
 0x29c   :  { %260 = vst.msk [vmem:[#allocation4] sm:$0x3] %vm259_vm8, %v322_v50 }
 0x29d   :  { %334 = shalt.err (!%p331_p4)
}
 0x29e   :  { %270 = dma.vmem_to_hbm [thread:$0]  %s268_s5, 32, %s426_s4, [#allocation5]  }
 0x29f   :  { %343 = dma.done.wait [#allocation5], 32  }
 0x2a0   :  { %344 = vsyncadd [#allocation5], 4294967264 }
 0x2a1   :  { %274 = vsyncpa [#allocation5], 1 }

</bundles_post_ra>
